<compile_context>
chip_gen: v6e
topology: v6e:2x2x1
jax: 0.10.0
libtpu: 0.0.40
codegen_flags: <defaults>
</compile_context>

<pallas_src>
import jax
import jax.numpy as jnp
from jax.experimental import pallas as pl
from jax.experimental.pallas import tpu as pltpu

# ----------------------------- model config ---------------------------------
IN_N = 2      # input dimension (2-D PDE coordinates, as in Deep Ritz)
M = 32        # block width
OUT_N = 1     # output dimension
DEPTH = 4     # number of residual blocks
BATCH = 256   # example batch size (must be a multiple of 128; ragged batches
              # are unsupported -- pad on the host if needed)

# io-slab column layout (slab shape: (M, IO_COLS))
C_WIN = 0                     # cols [0, IN_N)        : W_in            (M, IN_N)
C_BIN = IN_N                  # col  IN_N             : b_in            (M,)
C_WOUT = IN_N + 1             # col  IN_N+1           : W_out^T         (M,)
C_BOUT = IN_N + 2             # col  IN_N+2, row 0    : b_out scalar
C_BLK = IN_N + 3              # cols C_BLK+2d, +2d+1  : b1[d], b2[d]    (M,)
IO_COLS = IN_N + 3 + 2 * DEPTH


# ------------------------------ Pallas kernel -------------------------------
def drrnn_kernel(x_ref, wblk_ref, io_ref, o_ref):
    x = x_ref[...]             # (IN_N, TB)        batch on lanes
    io = io_ref[...]           # (M, IO_COLS)      bias / io-linear slab
    w1_all = wblk_ref[0]       # (M, DEPTH*M)      W1[d] at lanes [d*M, (d+1)*M)
    w2_all = wblk_ref[1]       # (M, DEPTH*M)      W2[d] at lanes [d*M, (d+1)*M)

    # ---- input linear: K = IN_N is degenerate -> VPU broadcast FMAs --------
    # h[m, b] = sum_k W_in[m, k] * x[k, b] + b_in[m]
    h = io[:, 0:1] * x[0:1, :]
    for k in range(1, IN_N):
        h = h + io[:, k:k + 1] * x[k:k + 1, :]
    h = h + io[:, C_BIN:C_BIN + 1]                       # (M, TB)

    # ---- residual blocks: tanh(W2 @ tanh(W1 @ h + b1) + b2) + h ------------
    # 32x32 @ 32xTB matmuls: lane-dense MXU N = TB.
    for d in range(DEPTH):                               # small, static unroll
        w1 = w1_all[:, d * M:(d + 1) * M]                # (M, M)
        w2 = w2_all[:, d * M:(d + 1) * M]                # (M, M)
        b1 = io[:, C_BLK + 2 * d:C_BLK + 2 * d + 1]      # (M, 1)
        b2 = io[:, C_BLK + 2 * d + 1:C_BLK + 2 * d + 2]  # (M, 1)
        t = jnp.tanh(jnp.dot(w1, h, preferred_element_type=jnp.float32) + b1)
        t = jnp.tanh(jnp.dot(w2, t, preferred_element_type=jnp.float32) + b2)
        h = t + h

    # ---- output linear: N = OUT_N = 1 -> VPU multiply + sublane reduce -----
    w_out = io[:, C_WOUT:C_WOUT + 1]                     # (M, 1)
    b_out = io[0:1, C_BOUT:C_BOUT + 1]                   # (1, 1)
    o_ref[...] = jnp.sum(w_out * h, axis=0, keepdims=True) + b_out


# ------------------------------ param packing -------------------------------
def pack_params(p):
    """Pack PyTorch-layout params into 2 lane-dense slabs (call ONCE at init)."""
    # weight slab (2, M, DEPTH*M): index 0 = W1 of all depths, 1 = W2.
    # wblk[0][m, d*M + k] == W1[d][m, k]  (PyTorch (out, in) layout preserved).
    w1_all = jnp.transpose(p["w1"], (1, 0, 2)).reshape(M, DEPTH * M)
    w2_all = jnp.transpose(p["w2"], (1, 0, 2)).reshape(M, DEPTH * M)
    wblk = jnp.stack([w1_all, w2_all], axis=0)           # (2, 32, 128) lane-dense

    # io slab: (M, IO_COLS)
    cols = [p["w_in"],                                   # (M, IN_N)
            p["b_in"][:, None],                          # (M, 1)
            p["w_out"].T,                                # (M, 1)
            jnp.zeros((M, 1), jnp.float32).at[0, 0].set(p["b_out"][0])]
    for d in range(DEPTH):
        cols.append(p["b1"][d][:, None])
        cols.append(p["b2"][d][:, None])
    io = jnp.concatenate(cols, axis=1)
    assert wblk.shape == (2, M, DEPTH * M)
    assert io.shape == (M, IO_COLS)
    return wblk, io


# --------------------------- grid / tiling policy ----------------------------
def _tensorcores_per_chip():
    """2 on dual-TC v7x, else 1. Safe fallback to 1 if the kind is unknown."""
    try:
        kind = jax.devices()[0].device_kind.lower()
    except Exception:
        return 1
    return 2 if ("v7" in kind or "7x" in kind) else 1


def _num_grid_steps(batch):
    """One 'parallel' step per TensorCore; on single-TC chips the grid is a
    serial loop (~0.35us/step overhead) so use a single TB=BATCH step.
    Keep TB <= 512 so the live (M, TB) activations fit the 64-vreg file."""
    cores = _tensorcores_per_chip()
    steps = cores if batch % (128 * cores) == 0 else 1
    while (batch // steps > 512
           and batch % (2 * steps) == 0
           and (batch // (2 * steps)) % 128 == 0):
        steps *= 2
    return steps


# ------------------------------ forward builder ------------------------------
def _build_forward(batch, num_steps, single_buffer_weights):
    tb = batch // num_steps
    # Grid-invariant weight slabs: request single-buffering when the grid has
    # more than one step (their index_maps are constant -> extra buffers and
    # per-step bookkeeping are pure waste).
    wkw = dict(pipeline_mode=pl.Buffered(1)) if single_buffer_weights else {}

    call = pl.pallas_call(
        drrnn_kernel,
        out_shape=jax.ShapeDtypeStruct((OUT_N, batch), jnp.float32),
        grid_spec=pltpu.PrefetchScalarGridSpec(
            num_scalar_prefetch=0,
            grid=(num_steps,),
            in_specs=[
                pl.BlockSpec((IN_N, tb), lambda i: (0, i)),            # x^T tile
                pl.BlockSpec((2, M, DEPTH * M), lambda i: (0, 0, 0), **wkw),
                pl.BlockSpec((M, IO_COLS), lambda i: (0, 0), **wkw),
            ],
            out_specs=pl.BlockSpec((OUT_N, tb), lambda i: (0, i)),     # lane-dense
        ),
        compiler_params=pltpu.CompilerParams(
            dimension_semantics=("parallel",)),
    )

    def fwd(x, wblk, io):
        # x: (B, IN_N) -> transpose, kernel, transpose back; all fused by jit.
        return call(x.T, wblk, io).T                                   # (B, OUT_N)

    return jax.jit(fwd)


def make_drrnn_forward(batch):
    """Build the jitted forward once (hoisted out of the per-call path)."""
    assert batch % 128 == 0, "batch must be a multiple of 128 (lane-dense tiles)"
    num_steps = _num_grid_steps(batch)
    arg_shapes = (jax.ShapeDtypeStruct((batch, IN_N), jnp.float32),
                  jax.ShapeDtypeStruct((2, M, DEPTH * M), jnp.float32),
                  jax.ShapeDtypeStruct((M, IO_COLS), jnp.float32))
    if num_steps > 1:
        # Probe-compile the single-buffered variant; fall back cleanly if this
        # Pallas version rejects pl.Buffered(1).
        try:
            fwd = _build_forward(batch, num_steps, single_buffer_weights=True)
            fwd.lower(*arg_shapes).compile()
            return fwd
        except Exception:
            pass
    return _build_forward(batch, num_steps, single_buffer_weights=False)


# ------------------------- deterministic param init -------------------------
def init_params(key):
    """Mimics nn.Linear default init; weights kept in PyTorch (out, in) layout."""
    def linear(k, fan_in, fan_out):
        kw, kb = jax.random.split(k)
        bound = 1.0 / jnp.sqrt(jnp.float32(fan_in))
        w = jax.random.uniform(kw, (fan_out, fan_in), jnp.float32, -bound, bound)
        b = jax.random.uniform(kb, (fan_out,), jnp.float32, -bound, bound)
        return w, b

    keys = jax.random.split(key, 2 + 2 * DEPTH)
    w_in, b_in = linear(keys[0], IN_N, M)
    w1s, b1s, w2s, b2s = [], [], [], []
    for d in range(DEPTH):
        w1, b1 = linear(keys[1 + 2 * d], M, M)
        w2, b2 = linear(keys[2 + 2 * d], M, M)
        w1s.append(w1); b1s.append(b1); w2s.append(w2); b2s.append(b2)
    w_out, b_out = linear(keys[-1], M, OUT_N)

    return {
        "w_in": w_in, "b_in": b_in,
        "w1": jnp.stack(w1s), "b1": jnp.stack(b1s),
        "w2": jnp.stack(w2s), "b2": jnp.stack(b2s),
        "w_out": w_out, "b_out": b_out,
    }


# ------------------------------ pure-JAX reference ---------------------------
def drrnn_reference(x, p):
    h = x @ p["w_in"].T + p["b_in"]
    for d in range(DEPTH):
        t = jnp.tanh(h @ p["w1"][d].T + p["b1"][d])
        t = jnp.tanh(t @ p["w2"][d].T + p["b2"][d])
        h = t + h
    return h @ p["w_out"].T + p["b_out"]


if __name__ == "__main__":
    key = jax.random.PRNGKey(0)
    kx, kp = jax.random.split(key)
    x = jax.random.normal(kx, (BATCH, IN_N), jnp.float32)
    params = init_params(kp)

    # Pack once at init time (hoisted out of the per-call path).
    wblk, io = pack_params(params)
    wblk = jax.device_put(wblk)
    io = jax.device_put(io)

    drrnn_forward = make_drrnn_forward(BATCH)            # jitted, built once

    out = jax.block_until_ready(drrnn_forward(x, wblk, io))

    ref = drrnn_reference(x, params)
    assert out.shape == (BATCH, OUT_N)
    assert jnp.allclose(out, ref, atol=1e-4, rtol=1e-4), "mismatch vs reference"

    print("KERNEL_OK")
</pallas_src>

<mosaic_0001>
module attributes {stable_mosaic.version = 11 : i64} {
  func.func @drrnn_kernel(%arg0: i32, %arg1: memref<2x256xf32, #tpu.memory_space<vmem>>, %arg2: memref<2x32x128xf32, #tpu.memory_space<vmem>>, %arg3: memref<32x13xf32, #tpu.memory_space<vmem>>, %arg4: memref<1x256xf32, #tpu.memory_space<vmem>>) attributes {dimension_semantics = [#tpu.dimension_semantics<parallel>], iteration_bounds = array<i64: 1>, scalar_prefetch = 0 : i64, scratch_operands = 0 : i64, tpu.core_type = #tpu.core_type<tc>, window_params = [{transform_indices = @transform_0, window_bounds = array<i64: 2, 256>}, {pipeline_mode = #tpu.pipeline_mode<synchronous>, transform_indices = @transform_1, window_bounds = array<i64: 2, 32, 128>}, {pipeline_mode = #tpu.pipeline_mode<synchronous>, transform_indices = @transform_2, window_bounds = array<i64: 32, 13>}, {transform_indices = @transform_3, window_bounds = array<i64: 1, 256>}]} {
    %c0 = arith.constant 0 : index
    %c0_0 = arith.constant 0 : index
    %0 = vector.load %arg1[%c0, %c0_0] : memref<2x256xf32, #tpu.memory_space<vmem>>, vector<2x256xf32>
    %c0_1 = arith.constant 0 : index
    %c0_2 = arith.constant 0 : index
    %1 = vector.load %arg3[%c0_1, %c0_2] : memref<32x13xf32, #tpu.memory_space<vmem>>, vector<32x13xf32>
    %c0_3 = arith.constant 0 : index
    %c0_4 = arith.constant 0 : index
    %c0_5 = arith.constant 0 : index
    %2 = vector.load %arg2[%c0_3, %c0_4, %c0_5] : memref<2x32x128xf32, #tpu.memory_space<vmem>>, vector<1x32x128xf32>
    %3 = vector.shape_cast %2 : vector<1x32x128xf32> to vector<32x128xf32>
    %c1 = arith.constant 1 : index
    %c0_6 = arith.constant 0 : index
    %c0_7 = arith.constant 0 : index
    %4 = vector.load %arg2[%c1, %c0_6, %c0_7] : memref<2x32x128xf32, #tpu.memory_space<vmem>>, vector<1x32x128xf32>
    %5 = vector.shape_cast %4 : vector<1x32x128xf32> to vector<32x128xf32>
    %6 = vector.extract_strided_slice %1 {offsets = [0, 0], sizes = [32, 1], strides = [1, 1]} : vector<32x13xf32> to vector<32x1xf32>
    %7 = vector.extract_strided_slice %0 {offsets = [0, 0], sizes = [1, 256], strides = [1, 1]} : vector<2x256xf32> to vector<1x256xf32>
    %8 = vector.broadcast %6 : vector<32x1xf32> to vector<32x256xf32>
    %9 = vector.broadcast %7 : vector<1x256xf32> to vector<32x256xf32>
    %10 = arith.mulf %8, %9 : vector<32x256xf32>
    %11 = vector.extract_strided_slice %1 {offsets = [0, 1], sizes = [32, 1], strides = [1, 1]} : vector<32x13xf32> to vector<32x1xf32>
    %12 = vector.extract_strided_slice %0 {offsets = [1, 0], sizes = [1, 256], strides = [1, 1]} : vector<2x256xf32> to vector<1x256xf32>
    %13 = vector.broadcast %11 : vector<32x1xf32> to vector<32x256xf32>
    %14 = vector.broadcast %12 : vector<1x256xf32> to vector<32x256xf32>
    %15 = arith.mulf %13, %14 : vector<32x256xf32>
    %16 = arith.addf %10, %15 : vector<32x256xf32>
    %17 = vector.extract_strided_slice %1 {offsets = [0, 2], sizes = [32, 1], strides = [1, 1]} : vector<32x13xf32> to vector<32x1xf32>
    %18 = vector.broadcast %17 : vector<32x1xf32> to vector<32x256xf32>
    %19 = arith.addf %16, %18 : vector<32x256xf32>
    %20 = vector.extract_strided_slice %3 {offsets = [0, 0], sizes = [32, 32], strides = [1, 1]} : vector<32x128xf32> to vector<32x32xf32>
    %21 = vector.extract_strided_slice %5 {offsets = [0, 0], sizes = [32, 32], strides = [1, 1]} : vector<32x128xf32> to vector<32x32xf32>
    %22 = vector.extract_strided_slice %1 {offsets = [0, 5], sizes = [32, 1], strides = [1, 1]} : vector<32x13xf32> to vector<32x1xf32>
    %23 = vector.extract_strided_slice %1 {offsets = [0, 6], sizes = [32, 1], strides = [1, 1]} : vector<32x13xf32> to vector<32x1xf32>
    %cst = arith.constant dense<0.000000e+00> : vector<32x256xf32>
    %24 = tpu.matmul %20, %19, %cst {dimension_numbers = #tpu.dot_dimension_numbers<[1], [0], [0], [1], [0, 0, 1, 1], [], []>} : vector<32x32xf32>, vector<32x256xf32>, vector<32x256xf32> -> vector<32x256xf32>
    %25 = vector.broadcast %22 : vector<32x1xf32> to vector<32x256xf32>
    %26 = arith.addf %24, %25 : vector<32x256xf32>
    %27 = math.tanh %26 : vector<32x256xf32>
    %cst_8 = arith.constant dense<0.000000e+00> : vector<32x256xf32>
    %28 = tpu.matmul %21, %27, %cst_8 {dimension_numbers = #tpu.dot_dimension_numbers<[1], [0], [0], [1], [0, 0, 1, 1], [], []>} : vector<32x32xf32>, vector<32x256xf32>, vector<32x256xf32> -> vector<32x256xf32>
    %29 = vector.broadcast %23 : vector<32x1xf32> to vector<32x256xf32>
    %30 = arith.addf %28, %29 : vector<32x256xf32>
    %31 = math.tanh %30 : vector<32x256xf32>
    %32 = arith.addf %31, %19 : vector<32x256xf32>
    %33 = vector.extract_strided_slice %3 {offsets = [0, 32], sizes = [32, 32], strides = [1, 1]} : vector<32x128xf32> to vector<32x32xf32>
    %34 = vector.extract_strided_slice %5 {offsets = [0, 32], sizes = [32, 32], strides = [1, 1]} : vector<32x128xf32> to vector<32x32xf32>
    %35 = vector.extract_strided_slice %1 {offsets = [0, 7], sizes = [32, 1], strides = [1, 1]} : vector<32x13xf32> to vector<32x1xf32>
    %36 = vector.extract_strided_slice %1 {offsets = [0, 8], sizes = [32, 1], strides = [1, 1]} : vector<32x13xf32> to vector<32x1xf32>
    %cst_9 = arith.constant dense<0.000000e+00> : vector<32x256xf32>
    %37 = tpu.matmul %33, %32, %cst_9 {dimension_numbers = #tpu.dot_dimension_numbers<[1], [0], [0], [1], [0, 0, 1, 1], [], []>} : vector<32x32xf32>, vector<32x256xf32>, vector<32x256xf32> -> vector<32x256xf32>
    %38 = vector.broadcast %35 : vector<32x1xf32> to vector<32x256xf32>
    %39 = arith.addf %37, %38 : vector<32x256xf32>
    %40 = math.tanh %39 : vector<32x256xf32>
    %cst_10 = arith.constant dense<0.000000e+00> : vector<32x256xf32>
    %41 = tpu.matmul %34, %40, %cst_10 {dimension_numbers = #tpu.dot_dimension_numbers<[1], [0], [0], [1], [0, 0, 1, 1], [], []>} : vector<32x32xf32>, vector<32x256xf32>, vector<32x256xf32> -> vector<32x256xf32>
    %42 = vector.broadcast %36 : vector<32x1xf32> to vector<32x256xf32>
    %43 = arith.addf %41, %42 : vector<32x256xf32>
    %44 = math.tanh %43 : vector<32x256xf32>
    %45 = arith.addf %44, %32 : vector<32x256xf32>
    %46 = vector.extract_strided_slice %3 {offsets = [0, 64], sizes = [32, 32], strides = [1, 1]} : vector<32x128xf32> to vector<32x32xf32>
    %47 = vector.extract_strided_slice %5 {offsets = [0, 64], sizes = [32, 32], strides = [1, 1]} : vector<32x128xf32> to vector<32x32xf32>
    %48 = vector.extract_strided_slice %1 {offsets = [0, 9], sizes = [32, 1], strides = [1, 1]} : vector<32x13xf32> to vector<32x1xf32>
    %49 = vector.extract_strided_slice %1 {offsets = [0, 10], sizes = [32, 1], strides = [1, 1]} : vector<32x13xf32> to vector<32x1xf32>
    %cst_11 = arith.constant dense<0.000000e+00> : vector<32x256xf32>
    %50 = tpu.matmul %46, %45, %cst_11 {dimension_numbers = #tpu.dot_dimension_numbers<[1], [0], [0], [1], [0, 0, 1, 1], [], []>} : vector<32x32xf32>, vector<32x256xf32>, vector<32x256xf32> -> vector<32x256xf32>
    %51 = vector.broadcast %48 : vector<32x1xf32> to vector<32x256xf32>
    %52 = arith.addf %50, %51 : vector<32x256xf32>
    %53 = math.tanh %52 : vector<32x256xf32>
    %cst_12 = arith.constant dense<0.000000e+00> : vector<32x256xf32>
    %54 = tpu.matmul %47, %53, %cst_12 {dimension_numbers = #tpu.dot_dimension_numbers<[1], [0], [0], [1], [0, 0, 1, 1], [], []>} : vector<32x32xf32>, vector<32x256xf32>, vector<32x256xf32> -> vector<32x256xf32>
    %55 = vector.broadcast %49 : vector<32x1xf32> to vector<32x256xf32>
    %56 = arith.addf %54, %55 : vector<32x256xf32>
    %57 = math.tanh %56 : vector<32x256xf32>
    %58 = arith.addf %57, %45 : vector<32x256xf32>
    %59 = vector.extract_strided_slice %3 {offsets = [0, 96], sizes = [32, 32], strides = [1, 1]} : vector<32x128xf32> to vector<32x32xf32>
    %60 = vector.extract_strided_slice %5 {offsets = [0, 96], sizes = [32, 32], strides = [1, 1]} : vector<32x128xf32> to vector<32x32xf32>
    %61 = vector.extract_strided_slice %1 {offsets = [0, 11], sizes = [32, 1], strides = [1, 1]} : vector<32x13xf32> to vector<32x1xf32>
    %62 = vector.extract_strided_slice %1 {offsets = [0, 12], sizes = [32, 1], strides = [1, 1]} : vector<32x13xf32> to vector<32x1xf32>
    %cst_13 = arith.constant dense<0.000000e+00> : vector<32x256xf32>
    %63 = tpu.matmul %59, %58, %cst_13 {dimension_numbers = #tpu.dot_dimension_numbers<[1], [0], [0], [1], [0, 0, 1, 1], [], []>} : vector<32x32xf32>, vector<32x256xf32>, vector<32x256xf32> -> vector<32x256xf32>
    %64 = vector.broadcast %61 : vector<32x1xf32> to vector<32x256xf32>
    %65 = arith.addf %63, %64 : vector<32x256xf32>
    %66 = math.tanh %65 : vector<32x256xf32>
    %cst_14 = arith.constant dense<0.000000e+00> : vector<32x256xf32>
    %67 = tpu.matmul %60, %66, %cst_14 {dimension_numbers = #tpu.dot_dimension_numbers<[1], [0], [0], [1], [0, 0, 1, 1], [], []>} : vector<32x32xf32>, vector<32x256xf32>, vector<32x256xf32> -> vector<32x256xf32>
    %68 = vector.broadcast %62 : vector<32x1xf32> to vector<32x256xf32>
    %69 = arith.addf %67, %68 : vector<32x256xf32>
    %70 = math.tanh %69 : vector<32x256xf32>
    %71 = arith.addf %70, %58 : vector<32x256xf32>
    %72 = vector.extract_strided_slice %1 {offsets = [0, 3], sizes = [32, 1], strides = [1, 1]} : vector<32x13xf32> to vector<32x1xf32>
    %73 = vector.extract_strided_slice %1 {offsets = [0, 4], sizes = [1, 1], strides = [1, 1]} : vector<32x13xf32> to vector<1x1xf32>
    %74 = vector.broadcast %72 : vector<32x1xf32> to vector<32x256xf32>
    %75 = arith.mulf %74, %71 : vector<32x256xf32>
    %cst_15 = arith.constant dense<0.000000e+00> : vector<256xf32>
    %76 = vector.multi_reduction <add>, %75, %cst_15 [0] : vector<32x256xf32> to vector<256xf32>
    %77 = vector.shape_cast %76 : vector<256xf32> to vector<1x256xf32>
    %78 = vector.broadcast %73 : vector<1x1xf32> to vector<1x256xf32>
    %79 = arith.addf %77, %78 : vector<1x256xf32>
    %c0_16 = arith.constant 0 : index
    %c0_17 = arith.constant 0 : index
    %80 = vector.load %arg4[%c0_16, %c0_17] : memref<1x256xf32, #tpu.memory_space<vmem>>, vector<1x256xf32>
    tpu.vector_store %arg4[%c0_16, %c0_17], %79 {strides = array<i32>} : memref<1x256xf32, #tpu.memory_space<vmem>>, vector<1x256xf32>,
    return
  }
  func.func @transform_0(%arg0: i32) -> (i32, i32) {
    %c0_i32 = arith.constant 0 : i32
    %c0_i32_0 = arith.constant 0 : i32
    return %c0_i32, %arg0 : i32, i32
  }
  func.func @transform_1(%arg0: i32) -> (i32, i32, i32) {
    %c0_i32 = arith.constant 0 : i32
    %c0_i32_0 = arith.constant 0 : i32
    %c0_i32_1 = arith.constant 0 : i32
    %c0_i32_2 = arith.constant 0 : i32
    return %c0_i32, %c0_i32_0, %c0_i32_1 : i32, i32, i32
  }
  func.func @transform_2(%arg0: i32) -> (i32, i32) {
    %c0_i32 = arith.constant 0 : i32
    %c0_i32_0 = arith.constant 0 : i32
    %c0_i32_1 = arith.constant 0 : i32
    return %c0_i32, %c0_i32_0 : i32, i32
  }
  func.func @transform_3(%arg0: i32) -> (i32, i32) {
    %c0_i32 = arith.constant 0 : i32
    %c0_i32_0 = arith.constant 0 : i32
    return %c0_i32, %arg0 : i32, i32
  }
}

</mosaic_0001>

<bundles_post_ra>
// kernel: fwd.1
= control target key start
LH: loop header
LB: loop body
LE: loop exit
PB: predicated region body
PF: predicated region fallthrough
CT: control target
= control target key end

     0   :  { %8 = vsyncpa [#allocation3], 0  ;;  %s1961_s0 = inlined_call_operand.vmem [shape: f32[2,256], index: 0, kind: input, shape index: {}]   ;;  %s1962_s1 = inlined_call_operand.hbm [shape: f32[2,32,128], index: 1, kind: input, shape index: {}]   ;;  %s1963_s2 = inlined_call_operand.vmem [shape: f32[32,13], index: 2, kind: input, shape index: {}]   ;;  %s1964_s3 = inlined_call_operand.hbm [shape: f32[1,256], index: 3, kind: output, shape index: {}]  }
   0x1   :  { %9 = vsyncpa [#allocation4], 0  ;;  %s1565_s12 = smov [#allocation2]  }
   0x2   :  { %s17_s13 = sshll.u32 %s1565_s12, 4  ;;  %s18_s13 = int_to_ptr.vmem [resolvable:$true] %s17_s13 }
   0x3   :  { %s1529_s14 = scalar_lea.vmem %s18_s13, 1024  ;;  %p1534_p1 = scmp.lt.s32.totalorder %s18_s13, %s18_s13 }
   0x4   :  { %p1530_p0 = scmp.ne.s32.totalorder %s18_s13, %s1529_s14  ;;  %p1535_p2 = scmp.lt.s32.totalorder %s1529_s14, %s1529_s14 }
   0x6   :  { %p1536_p3 = por %p1535_p2, %p1534_p1 }
   0x8   :  { %p1537_p4 = pnand %p1536_p3, %p1530_p0 }
   0xa   :  { %1540 = shalt.err (!%p1537_p4)
}
   0xb   :  { %s1566_s15 = smov 128   ;;  %s1567_s16 = smov 8  }
   0xc   :  { %23 = dma.hbm_to_vmem [thread:$0]  %s1962_s1, 1024, %s18_s13, [#allocation3], %s1566_s15, %s1566_s15, %s1567_s16  }
   0xd   :  { %1561 = dma.done.wait [#allocation3], 1024  }
   0xe   :  { %1562 = vsyncadd [#allocation3], 4294966272  ;;  %v1568_v0 = vmov 1   ;;  %v1569_v1 = vmov 0   ;;  %v1613_v2 = vld [vmem:[%s1963_s2 + $0x18] sm:$0xff]  ;;  %v1618_v3 = vld [vmem:[%s1963_s2 + $0x10] sm:$0xff]  ;;  %v64_v9 = vlaneseq }
   0xf   :  { %1361 = vset.pattern.permute.xlu0 %v1568_v0  ;;  %1362 = vset.pattern.permute.xlu1 %v1569_v1  ;;  %v1625_v4 = vld [vmem:[%s1963_s2 + $0x8] sm:$0xff]  ;;  %v1634_v5 = vld [vmem:[%s1963_s2] sm:$0xff]  ;;  %v1570_v6 = vmov 2   ;;  %v1571_v7 = vmov 0.0   ;;  %v1572_v8 = vmov 5   ;;  %vm180_vm0 = vcmask 261120  }
  0x10   :  { %103 = vperm.xlu0 %1361, %v1613_v2   ;;  %55 = vperm.xlu1 %1362, %v1618_v3   ;;  %v1649_v10 = vshrl.u32 %v64_v9, 7  ;;  %v29_v17 = vld [vmem:[%s1961_s0] sm:$0xf]  ;;  %s1574_s0 = smov 96   ;;  %s1577_s28 = smov 64   ;;  %vm1289_vm1 = vcmp.lt.s32.totalorder %v64_v9, 256 }
  0x11   :  { %257 = vmatprep.mubr.f32.mxu0 %v1571_v7  ;;  %382 = vmatprep.mubr.f32.mxu1 %v1571_v7  ;;  %s1580_s29 = smov 32  }
  0x12   :  { %v66_v11 = vsub.s32 0, %v1649_v10  ;;  %v70_v12 = vsub.s32 2, %v1649_v10  ;;  %v108_v14 = vsub.s32 1, %v1649_v10  ;;  %v112_v15 = vsub.s32 3, %v1649_v10 }
  0x14   :  { %1363 = vset.pattern.permute.xlu1 %v1568_v0  ;;  %95 = vperm.xlu0 %1361, %v1625_v4   ;;  %v67_v18 = vrot.slane %v29_v17, %v66_v11  ;;  %v71_v19 = vrot.slane %v29_v17, %v70_v12  ;;  %v109_v20 = vrot.slane %v29_v17, %v108_v14  ;;  %v1687_v12 = vld [vmem:[#allocation2 + $0x8] sm:$0xff] }
  0x15   :  { %99 = vperm.xlu1 %1363, %v1618_v3   ;;  %v113_v21 = vrot.slane %v29_v17, %v112_v15  ;;  %v1573_v15 = vmov 6  }
  0x16   :  { %v77_v24 = vrot.slane %v67_v18, %v66_v11  ;;  %v81_v25 = vrot.slane %v71_v19, %v66_v11  ;;  %v119_v26 = vrot.slane %v109_v20, %v108_v14  ;;  %v1680_v11 = vld [vmem:[#allocation2] sm:$0xff] }
  0x17   :  { %v123_v27 = vrot.slane %v113_v21, %v108_v14  ;;  %v1697_v14 = vld [vmem:[#allocation2 + $0x18] sm:$0xff] }
  0x18   :  { %1365 = vset.pattern.permute.xlu0 %v1569_v1 }
  0x19   :  { %1364 = vset.pattern.permute.xlu1 %v1569_v1  ;;  %60 = vperm.xlu0 %1365, %v1613_v2  }
  0x1a   :  { %50 = vperm.xlu1 %1364, %v1625_v4  }
  0x1d   :  { %45 = vperm.xlu0 %1365, %v1634_v5  }
  0x1e   :  { %1366 = vset.pattern.permute.xlu1 %v1570_v6 }
  0x1f   :  { %153 = vperm.xlu1 %1366, %v1613_v2  }
  0x21   :  { %1369 = vset.pattern.permute.xlu0 %v1570_v6 }
  0x22   :  { %145 = vperm.xlu0 %1369, %v1625_v4  }
  0x23   :  { %1367 = vset.pattern.permute.xlu1 %v1568_v0 }
  0x24   :  { %91 = vperm.xlu1 %1367, %v1634_v5  }
  0x26   :  { %1371 = vset.pattern.permute.xlu0 %v1572_v8 }
  0x27   :  { %173 = vperm.xlu0 %1371, %v1618_v3  }
  0x28   :  { %1368 = vset.pattern.permute.xlu1 %v1570_v6 }
  0x29   :  { %149 = vperm.xlu1 %1368, %v1618_v3  }
  0x2b   :  { %1372 = vset.pattern.permute.xlu0 %v1573_v15 }
  0x2c   :  { %303 = vperm.xlu0 %1372, %v1613_v2  }
  0x2d   :  { %141 = vperm.xlu1 %1368, %v1634_v5  }
  0x30   :  { %291 = vperm.xlu0 %1372, %v1634_v5  }
  0x31   :  { %1370 = vset.pattern.permute.xlu1 %v1572_v8 }
  0x32   :  { %177 = vperm.xlu1 %1370, %v1613_v2  }
  0x34   :  { %441 = vrot.lane.b32.xlu0 %v1687_v12, %s1574_s0 }
  0x36   :  { %169 = vperm.xlu1 %1370, %v1625_v4  }
  0x38   :  { %445 = vrot.lane.b32.xlu0 %v1697_v14, %s1574_s0 }
  0x3a   :  { %165 = vperm.xlu1 %1370, %v1634_v5  }
  0x3e   :  { %1373 = vset.pattern.permute.xlu1 %v1573_v15 }
  0x3f   :  { %299 = vperm.xlu1 %1373, %v1618_v3  }
  0x43   :  { %295 = vperm.xlu1 %1373, %v1625_v4  }
  0x47   :  { %439 = vrot.lane.b32.xlu1 %v1680_v11, %s1574_s0 }
  0x8b   :  { %v56_v13 = vpop.permute.xlu1 %55  ;;  %v104_v16 = vpop.permute.xlu0 %103 }
  0x8c   :  { %v130_v29 = vmul.f32 %v119_v26, %v104_v16  ;;  %v131_v30 = vmul.f32 %v123_v27, %v104_v16  ;;  %v86_v45 = vmul.f32 %v77_v24, %v56_v13  ;;  %v87_v46 = vmul.f32 %v81_v25, %v56_v13  ;;  %v1692_v13 = vld [vmem:[#allocation2 + $0x10] sm:$0xff] }
  0x8d   :  { %443 = vrot.lane.b32.xlu1 %v1692_v13, %s1574_s0 }
  0x8f   :  { %v96_v22 = vpop.permute.xlu0 %95 }
  0x90   :  { %v100_v23 = vpop.permute.xlu1 %99  ;;  %v127_v43 = vmul.f32 %v123_v27, %v96_v22  ;;  %v126_v47 = vmul.f32 %v119_v26, %v96_v22 }
  0x91   :  { %v128_v40 = vmul.f32 %v119_v26, %v100_v23  ;;  %v129_v41 = vmul.f32 %v123_v27, %v100_v23 }
  0x93   :  { %v136_v51 = vadd.f32 %v128_v40, %v86_v45  ;;  %v137_v52 = vadd.f32 %v129_v41, %v87_v46  ;;  %v1714_v45 = vld [vmem:[#allocation2 + $0x20] sm:$0xff] }
  0x94   :  { %v61_v28 = vpop.permute.xlu0 %60 }
  0x95   :  { %v88_v31 = vmul.f32 %v77_v24, %v61_v28  ;;  %v89_v32 = vmul.f32 %v81_v25, %v61_v28  ;;  %v51_v33 = vpop.permute.xlu1 %50 }
  0x96   :  { %v85_v44 = vmul.f32 %v81_v25, %v51_v33  ;;  %v84_v48 = vmul.f32 %v77_v24, %v51_v33 }
  0x97   :  { %v139_v34 = vadd.f32 %v131_v30, %v89_v32  ;;  %v138_v35 = vadd.f32 %v130_v29, %v88_v31 }
  0x98   :  { %v46_v39 = vpop.permute.xlu0 %45  ;;  %v135_v54 = vadd.f32 %v127_v43, %v85_v44  ;;  %v134_v60 = vadd.f32 %v126_v47, %v84_v48  ;;  %v1719_v47 = vld [vmem:[#allocation2 + $0x28] sm:$0xff]  ;;  %v1724_v48 = vld [vmem:[#allocation2 + $0x30] sm:$0xff] }
  0x99   :  { %v82_v56 = vmul.f32 %v77_v24, %v46_v39  ;;  %v83_v57 = vmul.f32 %v81_v25, %v46_v39 }
  0x9a   :  { %v154_v36 = vpop.permute.xlu1 %153 }
  0x9b   :  { %v1658_v37 = vadd.f32 %v154_v36, %v139_v34  ;;  %v1660_v38 = vadd.f32 %v154_v36, %v138_v35 }
  0x9d   :  { %217 = vmatprep.subr.mxu0 %v1658_v37  ;;  %v146_v53 = vpop.permute.xlu0 %145 }
  0x9e   :  { %218 = vmatpush1.msra.mxu0 %v1660_v38  ;;  %v1668_v61 = vadd.f32 %v146_v53, %v135_v54  ;;  %v1671_v0 = vadd.f32 %v146_v53, %v134_v60 }
  0x9f   :  { %v92_v42 = vpop.permute.xlu1 %91 }
  0xa0   :  { %v124_v49 = vmul.f32 %v119_v26, %v92_v42  ;;  %v125_v50 = vmul.f32 %v123_v27, %v92_v42 }
  0xa2   :  { %v132_v62 = vadd.f32 %v124_v49, %v82_v56  ;;  %v133_v63 = vadd.f32 %v125_v50, %v83_v57  ;;  %v174_v25 = vpop.permute.xlu0 %173  ;;  %v1729_v49 = vld [vmem:[#allocation2 + $0x38] sm:$0xff]  ;;  %v1575_v50 = vmov 7  }
  0xa3   :  { %1374 = vset.pattern.permute.xlu1 %v1575_v50  ;;  %1375 = vset.pattern.permute.xlu0 %v1575_v50 }
  0xa4   :  { %v150_v55 = vpop.permute.xlu1 %149  ;;  %436 = vperm.xlu1 %1374, %v1613_v2   ;;  %432 = vperm.xlu0 %1375, %v1618_v3  }
  0xa5   :  { %v1664_v58 = vadd.f32 %v150_v55, %v136_v51  ;;  %v1666_v59 = vadd.f32 %v150_v55, %v137_v52 }
  0xa7   :  { %219 = vmatprep.subr.mxu0 %v1666_v59  ;;  %v304_v57 = vpop.permute.xlu0 %303 }
  0xa8   :  { %v142_v1 = vpop.permute.xlu1 %141  ;;  %220 = vmatpush1.msra.mxu0 %v1664_v58  ;;  %428 = vperm.xlu1 %1374, %v1625_v4  }
  0xa9   :  { %v1674_v6 = vadd.f32 %v142_v1, %v132_v62  ;;  %v1676_v8 = vadd.f32 %v142_v1, %v133_v63  ;;  %221 = vmatprep.subr.mxu0 %v1668_v61  ;;  %568 = vrot.lane.b32.xlu0 %v1714_v45, %s1574_s0 }
  0xaa   :  { %222 = vmatpush1.msra.mxu0 %v1671_v0 }
  0xab   :  { %223 = vmatprep.subr.mxu0 %v1676_v8 }
  0xac   :  { %224 = vmatpush1.msra.mxu0 %v1674_v6  ;;  %424 = vperm.xlu1 %1374, %v1634_v5  }
  0xad   :  { %1307 = vmatmul.mubr.msk.f32.vlgmr.msra.gmra.mxu0 %vm180_vm0, %v1680_v11  ;;  %v178_v19 = vpop.permute.xlu1 %177  ;;  %572 = vrot.lane.b32.xlu0 %v1724_v48, %s1574_s0 }
  0xae   :  { %263 = vmatprep.mubr.f32.mxu0 %v1571_v7 }
  0xb0   :  { %570 = vrot.lane.b32.xlu1 %v1719_v47, %s1574_s0 }
  0xb1   :  { %1308 = vmatmul.mubr.msk.f32.gmra.mxu0 %vm180_vm0, %v1687_v12  ;;  %v170_v23 = vpop.permute.xlu1 %169 }
  0xb2   :  { %269 = vmatprep.mubr.f32.mxu0 %v1571_v7 }
  0xb4   :  { %574 = vrot.lane.b32.xlu1 %v1729_v49, %s1574_s0 }
  0xb5   :  { %1309 = vmatmul.mubr.msk.f32.gmra.mxu0 %vm180_vm0, %v1692_v13  ;;  %v166_v31 = vpop.permute.xlu1 %165 }
  0xb6   :  { %275 = vmatprep.mubr.f32.mxu0 %v1571_v7 }
  0xb9   :  { %1310 = vmatmul.mubr.msk.f32.gmra.mxu0 %vm180_vm0, %v1697_v14 }
  0xba   :  { %519 = vmatprep.mubr.f32.mxu0 %v1571_v7  ;;  %v300_v55 = vpop.permute.xlu1 %299 }
  0xbe   :  { %v296_v1 = vpop.permute.xlu1 %295 }
 0x16d   :  { %v259_v16 = vpop.f32.mrf.mxu0 }
 0x16e   :  { %v260_v35 = vadd.f32 %v259_v16, %v166_v31 }
 0x16f   :  { %v261_v17 = vpop.f32.mrf.mxu0 }
 0x170   :  { %v262_v34 = vadd.f32 %v261_v17, %v166_v31 }
 0x171   :  { %v265_v18 = vpop.f32.mrf.mxu0 }
 0x172   :  { %v266_v33 = vadd.f32 %v265_v18, %v170_v23  ;;  %v292_v18 = vpop.permute.xlu0 %291 }
 0x173   :  { %v267_v20 = vpop.f32.mrf.mxu0 }
 0x174   :  { %v268_v32 = vadd.f32 %v267_v20, %v170_v23 }
 0x175   :  { %v271_v21 = vpop.f32.mrf.mxu0 }
 0x176   :  { %v272_v30 = vadd.f32 %v271_v21, %v174_v25 }
 0x177   :  { %v273_v22 = vpop.f32.mrf.mxu0 }
 0x178   :  { %v274_v28 = vadd.f32 %v273_v22, %v174_v25 }
 0x179   :  { %v277_v24 = vpop.f32.mrf.mxu0 }
 0x17a   :  { %v278_v26 = vadd.f32 %v277_v24, %v178_v19 }
 0x17b   :  { %v279_v27 = vpop.f32.mrf.mxu0 }
 0x17c   :  { %v280_v29 = vadd.f32 %v279_v27, %v178_v19 }
 0x17e   :  { %1389 = vtanh.f32 %v280_v29 }
 0x17f   :  { %1391 = vtanh.f32 %v278_v26 }
 0x180   :  { %1393 = vtanh.f32 %v274_v28 }
 0x181   :  { %1395 = vtanh.f32 %v272_v30 }
 0x182   :  { %1397 = vtanh.f32 %v268_v32 }
 0x183   :  { %1399 = vtanh.f32 %v266_v33 }
 0x184   :  { %1401 = vtanh.f32 %v262_v34 }
 0x185   :  { %1403 = vtanh.f32 %v260_v35 }
 0x18b   :  { %v1390_v36 = vpop.eup %1389 }
 0x18c   :  { %v1392_v39 = vpop.eup %1391  ;;  %342 = vmatprep.subr.mxu1 %v1390_v36 }
 0x18d   :  { %v1394_v40 = vpop.eup %1393  ;;  %343 = vmatpush1.msra.mxu1 %v1392_v39 }
 0x18e   :  { %v1396_v41 = vpop.eup %1395  ;;  %344 = vmatprep.subr.mxu1 %v1394_v40 }
 0x18f   :  { %v1398_v42 = vpop.eup %1397  ;;  %345 = vmatpush1.msra.mxu1 %v1396_v41 }
 0x190   :  { %v1400_v43 = vpop.eup %1399  ;;  %346 = vmatprep.subr.mxu1 %v1398_v42 }
 0x191   :  { %v1402_v44 = vpop.eup %1401  ;;  %347 = vmatpush1.msra.mxu1 %v1400_v43 }
 0x192   :  { %v1404_v46 = vpop.eup %1403  ;;  %348 = vmatprep.subr.mxu1 %v1402_v44 }
 0x193   :  { %349 = vmatpush1.msra.mxu1 %v1404_v46 }
 0x194   :  { %1311 = vmatmul.mubr.msk.f32.vlgmr.msra.gmra.mxu1 %vm180_vm0, %v1714_v45 }
 0x195   :  { %388 = vmatprep.mubr.f32.mxu1 %v1571_v7 }
 0x198   :  { %1312 = vmatmul.mubr.msk.f32.gmra.mxu1 %vm180_vm0, %v1719_v47 }
 0x199   :  { %394 = vmatprep.mubr.f32.mxu1 %v1571_v7 }
 0x19c   :  { %1313 = vmatmul.mubr.msk.f32.gmra.mxu1 %vm180_vm0, %v1724_v48 }
 0x19d   :  { %400 = vmatprep.mubr.f32.mxu1 %v1571_v7 }
 0x1a0   :  { %1314 = vmatmul.mubr.msk.f32.gmra.mxu1 %vm180_vm0, %v1729_v49 }
 0x1a1   :  { %648 = vmatprep.mubr.f32.mxu1 %v1571_v7 }
 0x254   :  { %v384_v51 = vpop.f32.mrf.mxu1 }
 0x255   :  { %v385_v23 = vadd.f32 %v384_v51, %v292_v18 }
 0x256   :  { %v386_v52 = vpop.f32.mrf.mxu1 }
 0x257   :  { %v387_v22 = vadd.f32 %v386_v52, %v292_v18 }
 0x258   :  { %v390_v53 = vpop.f32.mrf.mxu1 }
 0x259   :  { %v391_v21 = vadd.f32 %v390_v53, %v296_v1 }
 0x25a   :  { %v392_v54 = vpop.f32.mrf.mxu1 }
 0x25b   :  { %v393_v19 = vadd.f32 %v392_v54, %v296_v1 }
 0x25c   :  { %v396_v56 = vpop.f32.mrf.mxu1 }
 0x25d   :  { %v397_v16 = vadd.f32 %v396_v56, %v300_v55 }
 0x25e   :  { %v398_v60 = vpop.f32.mrf.mxu1 }
 0x25f   :  { %v399_v62 = vadd.f32 %v398_v60, %v300_v55 }
 0x260   :  { %v402_v63 = vpop.f32.mrf.mxu1 }
 0x261   :  { %v403_v15 = vadd.f32 %v402_v63, %v304_v57  ;;  %1405 = vtanh.f32 %v399_v62 }
 0x262   :  { %v404_v17 = vpop.f32.mrf.mxu1 }
 0x263   :  { %v405_v20 = vadd.f32 %v404_v17, %v304_v57  ;;  %1407 = vtanh.f32 %v403_v15 }
 0x265   :  { %1409 = vtanh.f32 %v405_v20 }
 0x266   :  { %1411 = vtanh.f32 %v397_v16 }
 0x267   :  { %1413 = vtanh.f32 %v393_v19 }
 0x268   :  { %1415 = vtanh.f32 %v391_v21 }
 0x269   :  { %1417 = vtanh.f32 %v387_v22 }
 0x26a   :  { %1419 = vtanh.f32 %v385_v23 }
 0x26e   :  { %v1406_v24 = vpop.eup %1405 }
 0x26f   :  { %v1754_v32 = vadd.f32 %v1406_v24, %v1666_v59 }
 0x270   :  { %v1408_v25 = vpop.eup %1407 }
 0x271   :  { %v1750_v30 = vadd.f32 %v1408_v25, %v1660_v38 }
 0x272   :  { %v1410_v26 = vpop.eup %1409 }
 0x273   :  { %v1412_v27 = vpop.eup %1411  ;;  %v1747_v28 = vadd.f32 %v1410_v26, %v1658_v37 }
 0x274   :  { %v1414_v29 = vpop.eup %1413  ;;  %v1758_v34 = vadd.f32 %v1412_v27, %v1664_v58  ;;  %v440_v58 = vpop.permute.xlu1 %439 }
 0x275   :  { %v1416_v31 = vpop.eup %1415  ;;  %479 = vmatprep.subr.mxu0 %v1747_v28  ;;  %v1762_v37 = vadd.f32 %v1414_v29, %v1668_v61  ;;  %v442_v61 = vpop.permute.xlu0 %441  ;;  %v1578_v29 = vmov 9  }
 0x276   :  { %v1418_v33 = vpop.eup %1417  ;;  %480 = vmatpush1.msra.mxu0 %v1750_v30  ;;  %v1766_v38 = vadd.f32 %v1416_v31, %v1671_v0 }
 0x277   :  { %v1420_v35 = vpop.eup %1419  ;;  %481 = vmatprep.subr.mxu0 %v1754_v32  ;;  %v1770_v59 = vadd.f32 %v1418_v33, %v1676_v8 }
 0x278   :  { %482 = vmatpush1.msra.mxu0 %v1758_v34  ;;  %v1774_v36 = vadd.f32 %v1420_v35, %v1674_v6  ;;  %v444_v0 = vpop.permute.xlu1 %443  ;;  %v1576_v6 = vmov 8  }
 0x279   :  { %483 = vmatprep.subr.mxu0 %v1762_v37  ;;  %v446_v8 = vpop.permute.xlu0 %445  ;;  %1376 = vset.pattern.permute.xlu0 %v1576_v6 }
 0x27a   :  { %484 = vmatpush1.msra.mxu0 %v1766_v38  ;;  %1377 = vset.pattern.permute.xlu1 %v1576_v6 }
 0x27b   :  { %485 = vmatprep.subr.mxu0 %v1770_v59  ;;  %565 = vperm.xlu0 %1376, %v1613_v2  }
 0x27c   :  { %486 = vmatpush1.msra.mxu0 %v1774_v36  ;;  %561 = vperm.xlu1 %1377, %v1618_v3   ;;  %v437_v42 = vpop.permute.xlu1 %436 }
 0x27d   :  { %1315 = vmatmul.mubr.msk.f32.vlgmr.msra.gmra.mxu0 %vm180_vm0, %v440_v58  ;;  %v433_v52 = vpop.permute.xlu0 %432 }
 0x27e   :  { %525 = vmatprep.mubr.f32.mxu0 %v1571_v7 }
 0x27f   :  { %553 = vperm.xlu0 %1376, %v1634_v5  }
 0x280   :  { %557 = vperm.xlu1 %1377, %v1625_v4   ;;  %v429_v50 = vpop.permute.xlu1 %428 }
 0x281   :  { %1316 = vmatmul.mubr.msk.f32.gmra.mxu0 %vm180_vm0, %v442_v61  ;;  %v569_v23 = vpop.permute.xlu0 %568 }
 0x282   :  { %531 = vmatprep.mubr.f32.mxu0 %v1571_v7 }
 0x283   :  { %707 = vrot.lane.b32.xlu0 %v1687_v12, %s1577_s28 }
 0x284   :  { %705 = vrot.lane.b32.xlu1 %v1680_v11, %s1577_s28  ;;  %v425_v60 = vpop.permute.xlu1 %424  ;;  %1379 = vset.pattern.permute.xlu0 %v1578_v29 }
 0x285   :  { %1317 = vmatmul.mubr.msk.f32.gmra.mxu0 %vm180_vm0, %v444_v0  ;;  %v573_v26 = vpop.permute.xlu0 %572  ;;  %1378 = vset.pattern.permute.xlu1 %v1578_v29 }
 0x286   :  { %537 = vmatprep.mubr.f32.mxu0 %v1571_v7 }
 0x287   :  { %711 = vrot.lane.b32.xlu0 %v1697_v14, %s1577_s28 }
 0x288   :  { %709 = vrot.lane.b32.xlu1 %v1692_v13, %s1577_s28  ;;  %v571_v25 = vpop.permute.xlu1 %570 }
 0x289   :  { %1318 = vmatmul.mubr.msk.f32.gmra.mxu0 %vm180_vm0, %v446_v8 }
 0x28a   :  { %785 = vmatprep.mubr.f32.mxu0 %v1571_v7 }
 0x28b   :  { %698 = vperm.xlu0 %1379, %v1618_v3  }
 0x28c   :  { %v575_v27 = vpop.permute.xlu1 %574  ;;  %702 = vperm.xlu1 %1378, %v1613_v2  }
 0x28f   :  { %834 = vrot.lane.b32.xlu0 %v1714_v45, %s1577_s28 }
 0x290   :  { %694 = vperm.xlu1 %1378, %v1625_v4  }
 0x293   :  { %838 = vrot.lane.b32.xlu0 %v1724_v48, %s1577_s28 }
 0x294   :  { %690 = vperm.xlu1 %1378, %v1634_v5  }
 0x298   :  { %836 = vrot.lane.b32.xlu1 %v1719_v47, %s1577_s28 }
 0x29c   :  { %840 = vrot.lane.b32.xlu1 %v1729_v49, %s1577_s28 }
 0x2f6   :  { %v566_v8 = vpop.permute.xlu0 %565 }
 0x2f7   :  { %v562_v61 = vpop.permute.xlu1 %561 }
 0x33d   :  { %v521_v39 = vpop.f32.mrf.mxu0 }
 0x33e   :  { %v522_v15 = vadd.f32 %v521_v39, %v425_v60 }
 0x33f   :  { %v523_v40 = vpop.f32.mrf.mxu0 }
 0x340   :  { %v524_v1 = vadd.f32 %v523_v40, %v425_v60 }
 0x341   :  { %v527_v41 = vpop.f32.mrf.mxu0 }
 0x342   :  { %v528_v63 = vadd.f32 %v527_v41, %v429_v50  ;;  %v558_v41 = vpop.permute.xlu1 %557 }
 0x343   :  { %v529_v43 = vpop.f32.mrf.mxu0 }
 0x344   :  { %v530_v62 = vadd.f32 %v529_v43, %v429_v50 }
 0x345   :  { %v533_v44 = vpop.f32.mrf.mxu0 }
 0x346   :  { %v534_v57 = vadd.f32 %v533_v44, %v433_v52 }
 0x347   :  { %v535_v46 = vpop.f32.mrf.mxu0 }
 0x348   :  { %v536_v55 = vadd.f32 %v535_v46, %v433_v52  ;;  %v554_v46 = vpop.permute.xlu0 %553 }
 0x349   :  { %v539_v51 = vpop.f32.mrf.mxu0 }
 0x34a   :  { %v540_v53 = vadd.f32 %v539_v51, %v437_v42 }
 0x34b   :  { %v541_v54 = vpop.f32.mrf.mxu0 }
 0x34c   :  { %v542_v56 = vadd.f32 %v541_v54, %v437_v42 }
 0x34e   :  { %1421 = vtanh.f32 %v542_v56 }
 0x34f   :  { %1423 = vtanh.f32 %v540_v53 }
 0x350   :  { %1425 = vtanh.f32 %v536_v55 }
 0x351   :  { %1427 = vtanh.f32 %v534_v57 }
 0x352   :  { %1429 = vtanh.f32 %v530_v62 }
 0x353   :  { %1431 = vtanh.f32 %v528_v63 }
 0x354   :  { %1433 = vtanh.f32 %v524_v1 }
 0x355   :  { %1435 = vtanh.f32 %v522_v15 }
 0x35b   :  { %v1422_v16 = vpop.eup %1421 }
 0x35c   :  { %v1424_v17 = vpop.eup %1423  ;;  %608 = vmatprep.subr.mxu1 %v1422_v16 }
 0x35d   :  { %v1426_v18 = vpop.eup %1425  ;;  %609 = vmatpush1.msra.mxu1 %v1424_v17 }
 0x35e   :  { %v1428_v19 = vpop.eup %1427  ;;  %610 = vmatprep.subr.mxu1 %v1426_v18 }
 0x35f   :  { %v1430_v20 = vpop.eup %1429  ;;  %611 = vmatpush1.msra.mxu1 %v1428_v19 }
 0x360   :  { %v1432_v21 = vpop.eup %1431  ;;  %612 = vmatprep.subr.mxu1 %v1430_v20 }
 0x361   :  { %v1434_v22 = vpop.eup %1433  ;;  %613 = vmatpush1.msra.mxu1 %v1432_v21 }
 0x362   :  { %v1436_v24 = vpop.eup %1435  ;;  %614 = vmatprep.subr.mxu1 %v1434_v22 }
 0x363   :  { %615 = vmatpush1.msra.mxu1 %v1436_v24 }
 0x364   :  { %1319 = vmatmul.mubr.msk.f32.vlgmr.msra.gmra.mxu1 %vm180_vm0, %v569_v23 }
 0x365   :  { %654 = vmatprep.mubr.f32.mxu1 %v1571_v7 }
 0x368   :  { %1320 = vmatmul.mubr.msk.f32.gmra.mxu1 %vm180_vm0, %v571_v25 }
 0x369   :  { %660 = vmatprep.mubr.f32.mxu1 %v1571_v7 }
 0x36c   :  { %1321 = vmatmul.mubr.msk.f32.gmra.mxu1 %vm180_vm0, %v573_v26 }
 0x36d   :  { %666 = vmatprep.mubr.f32.mxu1 %v1571_v7 }
 0x370   :  { %1322 = vmatmul.mubr.msk.f32.gmra.mxu1 %vm180_vm0, %v575_v27 }
 0x371   :  { %914 = vmatprep.mubr.f32.mxu1 %v1571_v7 }
 0x424   :  { %v650_v31 = vpop.f32.mrf.mxu1 }
 0x425   :  { %v651_v54 = vadd.f32 %v650_v31, %v554_v46 }
 0x426   :  { %v652_v33 = vpop.f32.mrf.mxu1 }
 0x427   :  { %v653_v53 = vadd.f32 %v652_v33, %v554_v46 }
 0x428   :  { %v656_v35 = vpop.f32.mrf.mxu1 }
 0x429   :  { %v657_v52 = vadd.f32 %v656_v35, %v558_v41 }
 0x42a   :  { %v658_v58 = vpop.f32.mrf.mxu1 }
 0x42b   :  { %v659_v50 = vadd.f32 %v658_v58, %v558_v41 }
 0x42c   :  { %v662_v0 = vpop.f32.mrf.mxu1 }
 0x42d   :  { %v663_v43 = vadd.f32 %v662_v0, %v562_v61 }
 0x42e   :  { %v664_v6 = vpop.f32.mrf.mxu1 }
 0x42f   :  { %v665_v39 = vadd.f32 %v664_v6, %v562_v61 }
 0x430   :  { %v668_v40 = vpop.f32.mrf.mxu1 }
 0x431   :  { %v669_v42 = vadd.f32 %v668_v40, %v566_v8  ;;  %1437 = vtanh.f32 %v665_v39 }
 0x432   :  { %v670_v44 = vpop.f32.mrf.mxu1 }
 0x433   :  { %v671_v51 = vadd.f32 %v670_v44, %v566_v8  ;;  %1439 = vtanh.f32 %v669_v42 }
 0x435   :  { %1441 = vtanh.f32 %v671_v51 }
 0x436   :  { %1443 = vtanh.f32 %v663_v43 }
 0x437   :  { %1445 = vtanh.f32 %v659_v50 }
 0x438   :  { %1447 = vtanh.f32 %v657_v52 }
 0x439   :  { %1449 = vtanh.f32 %v653_v53 }
 0x43a   :  { %1451 = vtanh.f32 %v651_v54 }
 0x43e   :  { %v1438_v55 = vpop.eup %1437 }
 0x43f   :  { %v1826_v16 = vadd.f32 %v1438_v55, %v1754_v32  ;;  %v1581_v55 = vmov 11  }
 0x440   :  { %v1440_v56 = vpop.eup %1439 }
 0x441   :  { %v1822_v1 = vadd.f32 %v1440_v56, %v1750_v30 }
 0x442   :  { %v1442_v57 = vpop.eup %1441 }
 0x443   :  { %v1444_v60 = vpop.eup %1443  ;;  %v1819_v62 = vadd.f32 %v1442_v57, %v1747_v28 }
 0x444   :  { %v1446_v63 = vpop.eup %1445  ;;  %v1830_v18 = vadd.f32 %v1444_v60, %v1758_v34  ;;  %v706_v34 = vpop.permute.xlu1 %705 }
 0x445   :  { %v1448_v15 = vpop.eup %1447  ;;  %745 = vmatprep.subr.mxu0 %v1819_v62  ;;  %v1834_v28 = vadd.f32 %v1446_v63, %v1762_v37  ;;  %v708_v37 = vpop.permute.xlu0 %707 }
 0x446   :  { %v1450_v17 = vpop.eup %1449  ;;  %746 = vmatpush1.msra.mxu0 %v1822_v1  ;;  %v1838_v30 = vadd.f32 %v1448_v15, %v1766_v38 }
 0x447   :  { %v1452_v19 = vpop.eup %1451  ;;  %747 = vmatprep.subr.mxu0 %v1826_v16  ;;  %v1842_v32 = vadd.f32 %v1450_v17, %v1770_v59 }
 0x448   :  { %748 = vmatpush1.msra.mxu0 %v1830_v18  ;;  %v1846_v20 = vadd.f32 %v1452_v19, %v1774_v36  ;;  %v710_v38 = vpop.permute.xlu1 %709  ;;  %v1579_v36 = vmov 10  }
 0x449   :  { %749 = vmatprep.subr.mxu0 %v1834_v28  ;;  %v712_v59 = vpop.permute.xlu0 %711  ;;  %1380 = vset.pattern.permute.xlu0 %v1579_v36 }
 0x44a   :  { %750 = vmatpush1.msra.mxu0 %v1838_v30  ;;  %1381 = vset.pattern.permute.xlu1 %v1579_v36 }
 0x44b   :  { %751 = vmatprep.subr.mxu0 %v1842_v32  ;;  %831 = vperm.xlu0 %1380, %v1613_v2  }
 0x44c   :  { %752 = vmatpush1.msra.mxu0 %v1846_v20  ;;  %827 = vperm.xlu1 %1381, %v1618_v3   ;;  %v703_v24 = vpop.permute.xlu1 %702 }
 0x44d   :  { %1323 = vmatmul.mubr.msk.f32.vlgmr.msra.gmra.mxu0 %vm180_vm0, %v706_v34  ;;  %v699_v33 = vpop.permute.xlu0 %698 }
 0x44e   :  { %791 = vmatprep.mubr.f32.mxu0 %v1571_v7 }
 0x44f   :  { %819 = vperm.xlu0 %1380, %v1634_v5  }
 0x450   :  { %823 = vperm.xlu1 %1381, %v1625_v4   ;;  %v695_v29 = vpop.permute.xlu1 %694 }
 0x451   :  { %1324 = vmatmul.mubr.msk.f32.gmra.mxu0 %vm180_vm0, %v708_v37  ;;  %v835_v50 = vpop.permute.xlu0 %834 }
 0x452   :  { %797 = vmatprep.mubr.f32.mxu0 %v1571_v7 }
 0x453   :  { %973 = vrot.lane.b32.xlu0 %v1687_v12, %s1580_s29 }
 0x454   :  { %971 = vrot.lane.b32.xlu1 %v1680_v11, %s1580_s29  ;;  %v691_v0 = vpop.permute.xlu1 %690  ;;  %1383 = vset.pattern.permute.xlu0 %v1581_v55 }
 0x455   :  { %1325 = vmatmul.mubr.msk.f32.gmra.mxu0 %vm180_vm0, %v710_v38  ;;  %v839_v53 = vpop.permute.xlu0 %838  ;;  %1382 = vset.pattern.permute.xlu1 %v1581_v55 }
 0x456   :  { %803 = vmatprep.mubr.f32.mxu0 %v1571_v7 }
 0x457   :  { %977 = vrot.lane.b32.xlu0 %v1697_v14, %s1580_s29 }
 0x458   :  { %975 = vrot.lane.b32.xlu1 %v1692_v13, %s1580_s29  ;;  %v837_v52 = vpop.permute.xlu1 %836 }
 0x459   :  { %1326 = vmatmul.mubr.msk.f32.gmra.mxu0 %vm180_vm0, %v712_v59 }
 0x45a   :  { %1051 = vmatprep.mubr.f32.mxu0 %v1571_v7 }
 0x45b   :  { %964 = vperm.xlu0 %1383, %v1618_v3  }
 0x45c   :  { %v841_v54 = vpop.permute.xlu1 %840  ;;  %968 = vperm.xlu1 %1382, %v1613_v2  }
 0x45f   :  { %1100 = vrot.lane.b32.xlu0 %v1714_v45, %s1580_s29 }
 0x460   :  { %960 = vperm.xlu1 %1382, %v1625_v4  }
 0x463   :  { %1104 = vrot.lane.b32.xlu0 %v1724_v48, %s1580_s29 }
 0x464   :  { %956 = vperm.xlu1 %1382, %v1634_v5  }
 0x468   :  { %1102 = vrot.lane.b32.xlu1 %v1719_v47, %s1580_s29 }
 0x46c   :  { %1106 = vrot.lane.b32.xlu1 %v1729_v49, %s1580_s29 }
 0x4c6   :  { %v832_v63 = vpop.permute.xlu0 %831 }
 0x4c7   :  { %v828_v60 = vpop.permute.xlu1 %827 }
 0x4ca   :  { %v820_v37 = vpop.permute.xlu0 %819 }
 0x4cb   :  { %v824_v5 = vpop.permute.xlu1 %823 }
 0x50d   :  { %v787_v21 = vpop.f32.mrf.mxu0 }
 0x50e   :  { %v788_v6 = vadd.f32 %v787_v21, %v691_v0 }
 0x50f   :  { %v789_v22 = vpop.f32.mrf.mxu0 }
 0x510   :  { %v790_v14 = vadd.f32 %v789_v22, %v691_v0  ;;  %v1519_v0 = vld [vmem:[%s1963_s2 + $0x10] sm:$0xff] }
 0x511   :  { %v793_v23 = vpop.f32.mrf.mxu0 }
 0x512   :  { %v794_v8 = vadd.f32 %v793_v23, %v695_v29 }
 0x513   :  { %v795_v25 = vpop.f32.mrf.mxu0 }
 0x514   :  { %v796_v13 = vadd.f32 %v795_v25, %v695_v29 }
 0x515   :  { %v799_v26 = vpop.f32.mrf.mxu0 }
 0x516   :  { %v800_v61 = vadd.f32 %v799_v26, %v699_v33 }
 0x517   :  { %v801_v27 = vpop.f32.mrf.mxu0 }
 0x518   :  { %v802_v58 = vadd.f32 %v801_v27, %v699_v33 }
 0x519   :  { %v805_v31 = vpop.f32.mrf.mxu0 }
 0x51a   :  { %v806_v11 = vadd.f32 %v805_v31, %v703_v24 }
 0x51b   :  { %v807_v35 = vpop.f32.mrf.mxu0 }
 0x51c   :  { %v808_v12 = vadd.f32 %v807_v35, %v703_v24 }
 0x51e   :  { %1453 = vtanh.f32 %v808_v12  ;;  %v1517_v12 = vld [vmem:[%s1963_s2] sm:$0xff] }
 0x51f   :  { %1455 = vtanh.f32 %v806_v11 }
 0x520   :  { %1457 = vtanh.f32 %v802_v58 }
 0x521   :  { %1459 = vtanh.f32 %v800_v61  ;;  %v1518_v61 = vld [vmem:[%s1963_s2 + $0x8] sm:$0xff] }
 0x522   :  { %1461 = vtanh.f32 %v796_v13  ;;  %v1520_v13 = vld [vmem:[%s1963_s2 + $0x18] sm:$0xff]  ;;  %s1586_s2 = smov [#allocation5]  }
 0x523   :  { %1463 = vtanh.f32 %v794_v8  ;;  %v1583_v8 = vmov 3   ;;  %s1298_s11 = sshll.u32 %s1586_s2, 4  ;;  %s1299_s11 = int_to_ptr.vmem [resolvable:$true] %s1298_s11 }
 0x524   :  { %1465 = vtanh.f32 %v790_v14  ;;  %v1584_v14 = vmov 4   ;;  %s1541_s12 = scalar_lea.vmem %s1299_s11, 32  ;;  %p1546_p6 = scmp.lt.s32.totalorder %s1299_s11, %s1299_s11 }
 0x525   :  { %1467 = vtanh.f32 %v788_v6  ;;  %p1542_p5 = scmp.ne.s32.totalorder %s1299_s11, %s1541_s12  ;;  %p1547_p7 = scmp.lt.s32.totalorder %s1541_s12, %s1541_s12 }
 0x527   :  { %p1548_p8 = por %p1547_p7, %p1546_p6 }
 0x529   :  { %p1549_p9 = pnand %p1548_p8, %p1542_p5 }
 0x52b   :  { %v1454_v39 = vpop.eup %1453 }
 0x52c   :  { %v1456_v40 = vpop.eup %1455  ;;  %874 = vmatprep.subr.mxu1 %v1454_v39 }
 0x52d   :  { %v1458_v41 = vpop.eup %1457  ;;  %875 = vmatpush1.msra.mxu1 %v1456_v40 }
 0x52e   :  { %v1460_v42 = vpop.eup %1459  ;;  %876 = vmatprep.subr.mxu1 %v1458_v41 }
 0x52f   :  { %v1462_v43 = vpop.eup %1461  ;;  %877 = vmatpush1.msra.mxu1 %v1460_v42 }
 0x530   :  { %v1464_v44 = vpop.eup %1463  ;;  %878 = vmatprep.subr.mxu1 %v1462_v43 }
 0x531   :  { %v1466_v46 = vpop.eup %1465  ;;  %879 = vmatpush1.msra.mxu1 %v1464_v44 }
 0x532   :  { %v1468_v51 = vpop.eup %1467  ;;  %880 = vmatprep.subr.mxu1 %v1466_v46 }
 0x533   :  { %881 = vmatpush1.msra.mxu1 %v1468_v51 }
 0x534   :  { %1327 = vmatmul.mubr.msk.f32.vlgmr.msra.gmra.mxu1 %vm180_vm0, %v835_v50 }
 0x535   :  { %920 = vmatprep.mubr.f32.mxu1 %v1571_v7 }
 0x538   :  { %1328 = vmatmul.mubr.msk.f32.gmra.mxu1 %vm180_vm0, %v837_v52 }
 0x539   :  { %926 = vmatprep.mubr.f32.mxu1 %v1571_v7 }
 0x53c   :  { %1329 = vmatmul.mubr.msk.f32.gmra.mxu1 %vm180_vm0, %v839_v53 }
 0x53d   :  { %932 = vmatprep.mubr.f32.mxu1 %v1571_v7 }
 0x540   :  { %1330 = vmatmul.mubr.msk.f32.gmra.mxu1 %vm180_vm0, %v841_v54 }
 0x541   :  { %1180 = vmatprep.mubr.f32.mxu1 %v1571_v7 }
 0x5f4   :  { %v916_v56 = vpop.f32.mrf.mxu1 }
 0x5f5   :  { %v917_v36 = vadd.f32 %v916_v56, %v820_v37 }
 0x5f6   :  { %v918_v2 = vpop.f32.mrf.mxu1 }
 0x5f7   :  { %v919_v49 = vadd.f32 %v918_v2, %v820_v37 }
 0x5f8   :  { %v922_v57 = vpop.f32.mrf.mxu1 }
 0x5f9   :  { %v923_v59 = vadd.f32 %v922_v57, %v824_v5 }
 0x5fa   :  { %v924_v3 = vpop.f32.mrf.mxu1 }
 0x5fb   :  { %v925_v38 = vadd.f32 %v924_v3, %v824_v5 }
 0x5fc   :  { %v928_v4 = vpop.f32.mrf.mxu1 }
 0x5fd   :  { %v929_v34 = vadd.f32 %v928_v4, %v828_v60 }
 0x5fe   :  { %v930_v15 = vpop.f32.mrf.mxu1 }
 0x5ff   :  { %v931_v45 = vadd.f32 %v930_v15, %v828_v60 }
 0x600   :  { %v934_v17 = vpop.f32.mrf.mxu1 }
 0x601   :  { %v935_v19 = vadd.f32 %v934_v17, %v832_v63  ;;  %1469 = vtanh.f32 %v931_v45 }
 0x602   :  { %v936_v48 = vpop.f32.mrf.mxu1 }
 0x603   :  { %v937_v47 = vadd.f32 %v936_v48, %v832_v63  ;;  %1471 = vtanh.f32 %v935_v19 }
 0x605   :  { %1473 = vtanh.f32 %v937_v47 }
 0x606   :  { %1475 = vtanh.f32 %v929_v34 }
 0x607   :  { %1477 = vtanh.f32 %v925_v38 }
 0x608   :  { %1479 = vtanh.f32 %v923_v59 }
 0x609   :  { %1481 = vtanh.f32 %v919_v49 }
 0x60a   :  { %1483 = vtanh.f32 %v917_v36 }
 0x60e   :  { %v1470_v21 = vpop.eup %1469 }
 0x60f   :  { %v1898_v31 = vadd.f32 %v1470_v21, %v1826_v16 }
 0x610   :  { %v1472_v22 = vpop.eup %1471 }
 0x611   :  { %v1894_v27 = vadd.f32 %v1472_v22, %v1822_v1 }
 0x612   :  { %v1474_v23 = vpop.eup %1473 }
 0x613   :  { %v1476_v24 = vpop.eup %1475  ;;  %v1891_v25 = vadd.f32 %v1474_v23, %v1819_v62 }
 0x614   :  { %v1478_v26 = vpop.eup %1477  ;;  %v1902_v11 = vadd.f32 %v1476_v24, %v1830_v18  ;;  %v972_v18 = vpop.permute.xlu1 %971 }
 0x615   :  { %v1480_v29 = vpop.eup %1479  ;;  %1011 = vmatprep.subr.mxu0 %v1891_v25  ;;  %v1906_v62 = vadd.f32 %v1478_v26, %v1834_v28  ;;  %v974_v28 = vpop.permute.xlu0 %973 }
 0x616   :  { %v1482_v33 = vpop.eup %1481  ;;  %1012 = vmatpush1.msra.mxu0 %v1894_v27  ;;  %v1910_v1 = vadd.f32 %v1480_v29, %v1838_v30 }
 0x617   :  { %v1484_v35 = vpop.eup %1483  ;;  %1013 = vmatprep.subr.mxu0 %v1898_v31  ;;  %v1914_v16 = vadd.f32 %v1482_v33, %v1842_v32 }
 0x618   :  { %1014 = vmatpush1.msra.mxu0 %v1902_v11  ;;  %v1918_v58 = vadd.f32 %v1484_v35, %v1846_v20  ;;  %v976_v30 = vpop.permute.xlu1 %975  ;;  %v1582_v20 = vmov 12  }
 0x619   :  { %1015 = vmatprep.subr.mxu0 %v1906_v62  ;;  %v978_v32 = vpop.permute.xlu0 %977  ;;  %1384 = vset.pattern.permute.xlu0 %v1582_v20 }
 0x61a   :  { %1016 = vmatpush1.msra.mxu0 %v1910_v1  ;;  %1385 = vset.pattern.permute.xlu1 %v1582_v20 }
 0x61b   :  { %1017 = vmatprep.subr.mxu0 %v1914_v16  ;;  %1085 = vperm.xlu0 %1384, %v1517_v12  }
 0x61c   :  { %1018 = vmatpush1.msra.mxu0 %v1918_v58  ;;  %1089 = vperm.xlu1 %1385, %v1518_v61   ;;  %v969_v41 = vpop.permute.xlu1 %968 }
 0x61d   :  { %1331 = vmatmul.mubr.msk.f32.vlgmr.msra.gmra.mxu0 %vm180_vm0, %v972_v18  ;;  %v965_v51 = vpop.permute.xlu0 %964 }
 0x61e   :  { %1057 = vmatprep.mubr.f32.mxu0 %v1571_v7 }
 0x61f   :  { %1097 = vperm.xlu0 %1384, %v1520_v13  }
 0x620   :  { %1093 = vperm.xlu1 %1385, %v1519_v0   ;;  %v961_v46 = vpop.permute.xlu1 %960 }
 0x621   :  { %1332 = vmatmul.mubr.msk.f32.gmra.mxu0 %vm180_vm0, %v974_v28  ;;  %v1101_v48 = vpop.permute.xlu0 %1100 }
 0x622   :  { %1063 = vmatprep.mubr.f32.mxu0 %v1571_v7 }
 0x623   :  { %1387 = vset.pattern.permute.xlu0 %v1583_v8 }
 0x624   :  { %1386 = vset.pattern.permute.xlu1 %v1583_v8  ;;  %1226 = vperm.xlu0 %1387, %v1518_v61   ;;  %v957_v2 = vpop.permute.xlu1 %956 }
 0x625   :  { %1333 = vmatmul.mubr.msk.f32.gmra.mxu0 %vm180_vm0, %v976_v30  ;;  %1222 = vperm.xlu1 %1386, %v1517_v12   ;;  %v1105_v47 = vpop.permute.xlu0 %1104 }
 0x626   :  { %1069 = vmatprep.mubr.f32.mxu0 %v1571_v7 }
 0x628   :  { %1388 = vset.pattern.permute.xlu0 %v1584_v14  ;;  %v1103_v38 = vpop.permute.xlu1 %1102 }
 0x629   :  { %1334 = vmatmul.mubr.msk.f32.gmra.mxu0 %vm180_vm0, %v978_v32  ;;  %1230 = vperm.xlu1 %1386, %v1519_v0  }
 0x62a   :  { %1264 = vperm.xlu0 %1388, %v1517_v12  }
 0x62c   :  { %v1107_v59 = vpop.permute.xlu1 %1106 }
 0x62d   :  { %1234 = vperm.xlu1 %1386, %v1520_v13  }
 0x696   :  { %v1086_v49 = vpop.permute.xlu0 %1085 }
 0x697   :  { %v1090_v21 = vpop.permute.xlu1 %1089 }
 0x69a   :  { %v1098_v20 = vpop.permute.xlu0 %1097 }
 0x69b   :  { %v1094_v35 = vpop.permute.xlu1 %1093 }
 0x6a0   :  { %v1223_v8 = vpop.permute.xlu1 %1222 }
 0x6dd   :  { %v1053_v6 = vpop.f32.mrf.mxu0 }
 0x6de   :  { %v1054_v4 = vadd.f32 %v1053_v6, %v957_v2 }
 0x6df   :  { %v1055_v39 = vpop.f32.mrf.mxu0 }
 0x6e0   :  { %v1056_v60 = vadd.f32 %v1055_v39, %v957_v2 }
 0x6e1   :  { %v1059_v40 = vpop.f32.mrf.mxu0 }
 0x6e2   :  { %v1060_v3 = vadd.f32 %v1059_v40, %v961_v46 }
 0x6e3   :  { %v1061_v42 = vpop.f32.mrf.mxu0 }
 0x6e4   :  { %v1062_v57 = vadd.f32 %v1061_v42, %v961_v46  ;;  %v1227_v42 = vpop.permute.xlu0 %1226 }
 0x6e5   :  { %v1065_v43 = vpop.f32.mrf.mxu0 }
 0x6e6   :  { %v1066_v56 = vadd.f32 %v1065_v43, %v965_v51 }
 0x6e7   :  { %v1067_v44 = vpop.f32.mrf.mxu0 }
 0x6e8   :  { %v1068_v54 = vadd.f32 %v1067_v44, %v965_v51 }
 0x6e9   :  { %v1071_v50 = vpop.f32.mrf.mxu0 }
 0x6ea   :  { %v1072_v52 = vadd.f32 %v1071_v50, %v969_v41  ;;  %v1231_v50 = vpop.permute.xlu1 %1230 }
 0x6eb   :  { %v1073_v53 = vpop.f32.mrf.mxu0 }
 0x6ec   :  { %v1074_v55 = vadd.f32 %v1073_v53, %v969_v41 }
 0x6ee   :  { %1485 = vtanh.f32 %v1074_v55 }
 0x6ef   :  { %1487 = vtanh.f32 %v1072_v52 }
 0x6f0   :  { %1489 = vtanh.f32 %v1068_v54 }
 0x6f1   :  { %1491 = vtanh.f32 %v1066_v56 }
 0x6f2   :  { %1493 = vtanh.f32 %v1062_v57 }
 0x6f3   :  { %1495 = vtanh.f32 %v1060_v3 }
 0x6f4   :  { %1497 = vtanh.f32 %v1056_v60 }
 0x6f5   :  { %1499 = vtanh.f32 %v1054_v4 }
 0x6fb   :  { %v1486_v63 = vpop.eup %1485 }
 0x6fc   :  { %v1488_v15 = vpop.eup %1487  ;;  %1140 = vmatprep.subr.mxu1 %v1486_v63  ;;  %v1235_v63 = vpop.permute.xlu1 %1234 }
 0x6fd   :  { %v1490_v45 = vpop.eup %1489  ;;  %1141 = vmatpush1.msra.mxu1 %v1488_v15 }
 0x6fe   :  { %v1492_v17 = vpop.eup %1491  ;;  %1142 = vmatprep.subr.mxu1 %v1490_v45 }
 0x6ff   :  { %v1494_v5 = vpop.eup %1493  ;;  %1143 = vmatpush1.msra.mxu1 %v1492_v17 }
 0x700   :  { %v1496_v19 = vpop.eup %1495  ;;  %1144 = vmatprep.subr.mxu1 %v1494_v5 }
 0x701   :  { %v1498_v34 = vpop.eup %1497  ;;  %1145 = vmatpush1.msra.mxu1 %v1496_v19 }
 0x702   :  { %v1500_v37 = vpop.eup %1499  ;;  %1146 = vmatprep.subr.mxu1 %v1498_v34 }
 0x703   :  { %1147 = vmatpush1.msra.mxu1 %v1500_v37 }
 0x704   :  { %1335 = vmatmul.mubr.msk.f32.vlgmr.msra.gmra.mxu1 %vm180_vm0, %v1101_v48 }
 0x705   :  { %1186 = vmatprep.mubr.f32.mxu1 %v1571_v7 }
 0x708   :  { %1336 = vmatmul.mubr.msk.f32.gmra.mxu1 %vm180_vm0, %v1103_v38 }
 0x709   :  { %1192 = vmatprep.mubr.f32.mxu1 %v1571_v7 }
 0x70c   :  { %1337 = vmatmul.mubr.msk.f32.gmra.mxu1 %vm180_vm0, %v1105_v47 }
 0x70d   :  { %1198 = vmatprep.mubr.f32.mxu1 %v1571_v7 }
 0x710   :  { %1338 = vmatmul.mubr.msk.f32.gmra.mxu1 %vm180_vm0, %v1107_v59  ;;  %v1585_v59 = vmov 1966171168  }
 0x7c4   :  { %v1182_v36 = vpop.f32.mrf.mxu1 }
 0x7c5   :  { %v1183_v22 = vadd.f32 %v1182_v36, %v1086_v49 }
 0x7c6   :  { %v1184_v23 = vpop.f32.mrf.mxu1 }
 0x7c7   :  { %v1185_v24 = vadd.f32 %v1184_v23, %v1086_v49  ;;  %1501 = vtanh.f32 %v1183_v22  ;;  %v1273_v49 = vunpack.c.l.s4 %v1585_v59 }
 0x7c8   :  { %v1188_v26 = vpop.f32.mrf.mxu1 }
 0x7c9   :  { %v1189_v29 = vadd.f32 %v1188_v26, %v1090_v21  ;;  %v1274_v23 = vunpack.c.0.s8 %v1273_v49 }
 0x7ca   :  { %v1190_v33 = vpop.f32.mrf.mxu1 }
 0x7cb   :  { %1503 = vtanh.f32 %v1189_v29  ;;  %v1191_v18 = vadd.f32 %v1190_v33, %v1090_v21  ;;  %v1277_v33 = vsub.s32 %v1274_v23, %v1649_v10 }
 0x7cc   :  { %1505 = vtanh.f32 %v1185_v24  ;;  %v1194_v28 = vpop.f32.mrf.mxu1 }
 0x7cd   :  { %1507 = vtanh.f32 %v1191_v18  ;;  %v1195_v30 = vadd.f32 %v1194_v28, %v1094_v35 }
 0x7ce   :  { %v1196_v7 = vpop.f32.mrf.mxu1 }
 0x7cf   :  { %1509 = vtanh.f32 %v1195_v30  ;;  %v1197_v32 = vadd.f32 %v1196_v7, %v1094_v35 }
 0x7d0   :  { %v1200_v12 = vpop.f32.mrf.mxu1 }
 0x7d1   :  { %1511 = vtanh.f32 %v1197_v32  ;;  %v1201_v61 = vadd.f32 %v1200_v12, %v1098_v20 }
 0x7d2   :  { %v1202_v0 = vpop.f32.mrf.mxu1 }
 0x7d3   :  { %1513 = vtanh.f32 %v1201_v61  ;;  %v1203_v13 = vadd.f32 %v1202_v0, %v1098_v20 }
 0x7d4   :  { %v1502_v14 = vpop.eup %1501 }
 0x7d5   :  { %1515 = vtanh.f32 %v1203_v13  ;;  %v1213_v43 = vadd.f32 %v1502_v14, %v1918_v58 }
 0x7d7   :  { %v1237_v55 = vmul.f32 %v1223_v8, %v1213_v43 }
 0x7d8   :  { %v1504_v6 = vpop.eup %1503 }
 0x7d9   :  { %v1506_v39 = vpop.eup %1505  ;;  %v1215_v40 = vadd.f32 %v1504_v6, %v1910_v1 }
 0x7da   :  { %v1508_v41 = vpop.eup %1507  ;;  %v1214_v51 = vadd.f32 %v1506_v39, %v1914_v16 }
 0x7db   :  { %v1216_v44 = vadd.f32 %v1508_v41, %v1906_v62  ;;  %v1239_v52 = vmul.f32 %v1227_v42, %v1215_v40 }
 0x7dc   :  { %v1510_v46 = vpop.eup %1509  ;;  %v1238_v3 = vmul.f32 %v1223_v8, %v1214_v51 }
 0x7dd   :  { %v1217_v53 = vadd.f32 %v1510_v46, %v1902_v11  ;;  %v1240_v56 = vmul.f32 %v1227_v42, %v1216_v44  ;;  %v1245_v60 = vadd.f32 %v1239_v52, %v1237_v55 }
 0x7de   :  { %v1512_v54 = vpop.eup %1511 }
 0x7df   :  { %v1218_v2 = vadd.f32 %v1512_v54, %v1898_v31  ;;  %v1241_v57 = vmul.f32 %v1231_v50, %v1217_v53  ;;  %v1254_v15 = vadd.f32 %v1240_v56, %v1238_v3 }
 0x7e0   :  { %v1514_v1 = vpop.eup %1513 }
 0x7e1   :  { %v1242_v4 = vmul.f32 %v1231_v50, %v1218_v2  ;;  %v1219_v58 = vadd.f32 %v1514_v1, %v1894_v27  ;;  %v1246_v45 = vadd.f32 %v1245_v60, %v1241_v57 }
 0x7e2   :  { %v1516_v62 = vpop.eup %1515 }
 0x7e3   :  { %v1220_v16 = vadd.f32 %v1516_v62, %v1891_v25  ;;  %v1243_v17 = vmul.f32 %v1235_v63, %v1219_v58  ;;  %v1255_v11 = vadd.f32 %v1254_v15, %v1242_v4  ;;  %v1265_v25 = vpop.permute.xlu0 %1264 }
 0x7e5   :  { %v1244_v5 = vmul.f32 %v1235_v63, %v1220_v16  ;;  %v1247_v19 = vadd.f32 %v1246_v45, %v1243_v17 }
 0x7e7   :  { %v1248_v34 = vrot.slane %v1247_v19, 4  ;;  %v1256_v48 = vadd.f32 %v1255_v11, %v1244_v5 }
 0x7e9   :  { %v1249_v31 = vadd.f32 %v1248_v34, %v1247_v19  ;;  %v1257_v37 = vrot.slane %v1256_v48, 4 }
 0x7eb   :  { %v1258_v38 = vadd.f32 %v1257_v37, %v1256_v48  ;;  %v1250_v47 = vrot.slane %v1249_v31, 2 }
 0x7ed   :  { %v1251_v36 = vadd.f32 %v1250_v47, %v1249_v31  ;;  %v1259_v27 = vrot.slane %v1258_v38, 2 }
 0x7ef   :  { %v1252_v21 = vrot.slane %v1251_v36, 1  ;;  %v1260_v22 = vadd.f32 %v1259_v27, %v1258_v38 }
 0x7f1   :  { %v1253_v24 = vadd.f32 %v1252_v21, %v1251_v36  ;;  %v1261_v26 = vrot.slane %v1260_v22, 1 }
 0x7f3   :  { %v1262_v29 = vadd.f32 %v1261_v26, %v1260_v22  ;;  %v1267_v35 = vadd.f32 %v1265_v25, %v1253_v24 }
 0x7f5   :  { %v1268_v18 = vadd.f32 %v1265_v25, %v1262_v29 }
 0x7f7   :  { %v1271_v28 = vcombine.low %v1267_v35, %v1268_v18 }
 0x7f9   :  { %v1278_v30 = vrot.slane %v1271_v28, %v1277_v33 }
 0x7fb   :  { %v1285_v7 = vrot.slane %v1278_v30, %v1277_v33 }
 0x7fd   :  { %1291 = vst.msk [vmem:[#allocation5] sm:$0x3] %vm1289_vm1, %v1285_v7 }
 0x7fe   :  { %1552 = shalt.err (!%p1549_p9)
}
 0x7ff   :  { %1301 = dma.vmem_to_hbm [thread:$0]  %s1299_s11, 32, %s1964_s3, [#allocation4]  }
 0x800   :  { %1563 = dma.done.wait [#allocation4], 32  }
 0x801   :  { %1564 = vsyncadd [#allocation4], 4294967264 }
 0x802   :  { %1305 = vsyncpa [#allocation3], 1 }
 0x803   :  { %1306 = vsyncpa [#allocation4], 1 }

</bundles_post_ra>
